<compile_context>
chip_gen: v5e
topology: v5e:2x2
jax: 0.10.0
libtpu: 0.0.40
codegen_flags: <defaults>
</compile_context>

<pallas_src>
import functools

import jax
import jax.numpy as jnp
from jax.experimental import pallas as pl
from jax.experimental.pallas import tpu as pltpu


def _round_up(x, m):
    return ((x + m - 1) // m) * m


def _ffn_kernel(x_ref, w13_ref, w2_ref, o_ref):
    # x_ref  : (tm, D)     activations in the caller's dtype (f32 or bf16)
    # w13_ref: (D, 2*Hp)   fused [w1^T | w3^T] up-projection, bf16 (VMEM-resident)
    # w2_ref : (Hp, D)     down-projection w2^T, bf16 (VMEM-resident)
    # o_ref  : (tm, D)     output rows, written directly in the final dtype
    hp = w2_ref.shape[0]

    # Cast to bf16 in-kernel (VPU) so the MXU sees bf16 operands; no extra
    # wrapper-side cast pass over HBM.
    x = x_ref[...].astype(w13_ref.dtype)

    # One MXU pass over x produces both up-projections (f32 accumulation).
    h = jnp.dot(x, w13_ref[...], preferred_element_type=jnp.float32)   # (tm, 2*Hp)
    h1 = h[:, :hp]          # lane slice at a 128-multiple boundary (cheap)
    h3 = h[:, hp:]

    # SwiGLU gate: silu(h1) * h3  (VPU / EUP elementwise, f32).
    gated = (h1 * jax.nn.sigmoid(h1)) * h3                             # (tm, Hp)

    # Down-projection: bf16 operands, f32 accumulation; store in final dtype.
    out = jnp.dot(gated.astype(w2_ref.dtype), w2_ref[...],
                  preferred_element_type=jnp.float32)                  # (tm, D)
    o_ref[...] = out.astype(o_ref.dtype)
    # TODO(synk): dropout omitted (identity in eval / p=0); training-mode dropout
    # would use pltpu.prng_seed + pltpu.stateful_bernoulli to mask `out`.
    # TODO(synk): D=64 (<128 lanes) still forces masked partial stores on o_ref;
    # fusing the residual add / following norm into this kernel (or emitting a
    # lane-dense paired-token (tm/2, 128) slab) would amortize the narrow store.


def prepare_ffn_weights(w1, w2, w3, *, compute_dtype=jnp.bfloat16, lane=128):
    """One-time weight preparation (do at parameter init, NOT per forward call).

    w1, w3 : (H, D)  PyTorch nn.Linear layout (out_features, in_features)
    w2     : (D, H)

    Returns:
      w13 : (D, 2*Hp)  fused [w1^T | w3^T], hidden zero-padded to 128-lane multiple
      w2p : (Hp, D)    w2^T with zero-padded hidden rows
    """
    # TODO(synk): on v5e (MXU-occupancy-bound) the 192->256 hidden padding adds
    # ~20-25% zero-FLOPs; there, pass w1/w3 unpadded as two separate full-array
    # specs instead. On v6e/v7x the padded K=256 down-projection is fine.
    H, D = w1.shape
    Hp = _round_up(H, lane)
    w1_t = jnp.zeros((D, Hp), compute_dtype).at[:, :H].set(w1.T.astype(compute_dtype))
    w3_t = jnp.zeros((D, Hp), compute_dtype).at[:, :H].set(w3.T.astype(compute_dtype))
    w13 = jnp.concatenate([w1_t, w3_t], axis=1)                        # (D, 2*Hp)
    w2p = jnp.zeros((Hp, D), compute_dtype).at[:H, :].set(w2.T.astype(compute_dtype))
    return w13, w2p


@functools.partial(jax.jit, static_argnames=("tm",))
def feed_forward(x, w13, w2p, *, tm=None):
    """
    x   : (B, T, D)  f32 or bf16
    w13 : (D, 2*Hp)  from prepare_ffn_weights
    w2p : (Hp, D)    from prepare_ffn_weights
    returns (B, T, D) in x.dtype
    """
    B, T, D = x.shape
    Hp = w2p.shape[0]
    M = B * T

    if tm is None:
        # Large row tiles amortize per-grid-step overhead and the resident-weight
        # DMA; 8-aligned, capped at the token count for small inputs. With the
        # 512 cap, any M >= 1024 gives >= 2 "parallel" grid steps (v7x megacore).
        tm = min(512, _round_up(M, 8))

    x2 = x.reshape(M, D)     # metadata-only reshape; no pad, no cast pass

    out = pl.pallas_call(
        _ffn_kernel,
        out_shape=jax.ShapeDtypeStruct((M, D), x.dtype),
        grid_spec=pltpu.PrefetchScalarGridSpec(
            num_scalar_prefetch=0,
            grid=(pl.cdiv(M, tm),),
            in_specs=[
                # x row tile (double-buffered / pipelined); ragged last block
                # is clipped on writeback, so no wrapper-side padding needed.
                pl.BlockSpec((tm, D), lambda i: (i, 0)),
                # fused w1|w3 (constant index_map -> fetched once, single buffer)
                pl.BlockSpec((D, 2 * Hp), lambda i: (0, 0),
                             pipeline_mode=pl.Buffered(1)),
                # w2 (constant index_map -> fetched once, single buffer)
                pl.BlockSpec((Hp, D), lambda i: (0, 0),
                             pipeline_mode=pl.Buffered(1)),
            ],
            out_specs=pl.BlockSpec((tm, D), lambda i: (i, 0)),
        ),
        compiler_params=pltpu.CompilerParams(
            dimension_semantics=("parallel",),
        ),
    )(x2, w13, w2p)

    return out.reshape(B, T, D)


def feed_forward_ref(x, w1, w2, w3, compute_dtype=jnp.bfloat16):
    """Pure-JAX reference with matching bf16-operand / f32-accumulate matmuls."""
    xb = x.astype(compute_dtype)
    h1 = jnp.dot(xb, w1.T.astype(compute_dtype), preferred_element_type=jnp.float32)
    h3 = jnp.dot(xb, w3.T.astype(compute_dtype), preferred_element_type=jnp.float32)
    g = (h1 * jax.nn.sigmoid(h1)) * h3
    out = jnp.dot(g.astype(compute_dtype), w2.T.astype(compute_dtype),
                  preferred_element_type=jnp.float32)
    return out.astype(x.dtype)


def feed_forward_ref_f32(x, w1, w2, w3):
    h1 = jnp.einsum("btd,hd->bth", x, w1)
    h3 = jnp.einsum("btd,hd->bth", x, w3)
    g = (h1 * jax.nn.sigmoid(h1)) * h3
    return jnp.einsum("bth,dh->btd", g, w2)


if __name__ == "__main__":
    # Config (matches the module's hidden_dim derivation):
    dim = 64
    multiple_of = 32
    hidden_dim = int(2 * (4 * dim) / 3)
    hidden_dim = multiple_of * ((hidden_dim + multiple_of - 1) // multiple_of)  # -> 192

    B, T = 2, 8

    key = jax.random.PRNGKey(0)
    kx, k1, k2, k3 = jax.random.split(key, 4)
    x = jax.random.normal(kx, (B, T, dim), dtype=jnp.float32)
    # Deterministic "Linear" weights (PyTorch layout: (out_features, in_features))
    w1 = jax.random.normal(k1, (hidden_dim, dim), dtype=jnp.float32) * 0.05
    w2 = jax.random.normal(k2, (dim, hidden_dim), dtype=jnp.float32) * 0.05
    w3 = jax.random.normal(k3, (hidden_dim, dim), dtype=jnp.float32) * 0.05

    # One-time weight prep: fuse w1|w3, transpose to (in,out), bf16, lane-pad hidden.
    w13, w2p = prepare_ffn_weights(w1, w2, w3)

    out = feed_forward(x, w13, w2p)
    out = jax.block_until_ready(out)
    assert out.shape == (B, T, dim)
    assert out.dtype == x.dtype

    # Check against a precision-matched (bf16 matmul, f32 accumulate) reference.
    ref = feed_forward_ref(x, w1, w2, w3)
    assert jnp.allclose(out, ref, atol=5e-3, rtol=5e-3), "mismatch vs bf16 reference"

    # Loose sanity check against the full-f32 PyTorch-equivalent math.
    ref32 = feed_forward_ref_f32(x, w1, w2, w3)
    assert jnp.allclose(out, ref32, atol=1e-1, rtol=1e-1), "mismatch vs f32 reference"

    print("KERNEL_OK")
</pallas_src>

<mosaic_0001>
module attributes {stable_mosaic.version = 11 : i64} {
  func.func @_ffn_kernel(%arg0: i32, %arg1: memref<16x64xf32, #tpu.memory_space<vmem>>, %arg2: memref<64x512xbf16, #tpu.memory_space<vmem>>, %arg3: memref<256x64xbf16, #tpu.memory_space<vmem>>, %arg4: memref<16x64xf32, #tpu.memory_space<vmem>>) attributes {dimension_semantics = [#tpu.dimension_semantics<parallel>], iteration_bounds = array<i64: 1>, scalar_prefetch = 0 : i64, scratch_operands = 0 : i64, tpu.core_type = #tpu.core_type<tc>, window_params = [{transform_indices = @transform_0, window_bounds = array<i64: 16, 64>}, {pipeline_mode = #tpu.pipeline_mode<synchronous>, transform_indices = @transform_1, window_bounds = array<i64: 64, 512>}, {pipeline_mode = #tpu.pipeline_mode<synchronous>, transform_indices = @transform_2, window_bounds = array<i64: 256, 64>}, {transform_indices = @transform_3, window_bounds = array<i64: 16, 64>}]} {
    %c0 = arith.constant 0 : index
    %c0_0 = arith.constant 0 : index
    %0 = vector.load %arg1[%c0, %c0_0] : memref<16x64xf32, #tpu.memory_space<vmem>>, vector<16x64xf32>
    %1 = arith.truncf %0 : vector<16x64xf32> to vector<16x64xbf16>
    %c0_1 = arith.constant 0 : index
    %c0_2 = arith.constant 0 : index
    %2 = vector.load %arg2[%c0_1, %c0_2] : memref<64x512xbf16, #tpu.memory_space<vmem>>, vector<64x512xbf16>
    %cst = arith.constant dense<0.000000e+00> : vector<16x512xf32>
    %3 = tpu.matmul %1, %2, %cst {dimension_numbers = #tpu.dot_dimension_numbers<[1], [0], [0], [1], [0, 0, 1, 1], [], []>} : vector<16x64xbf16>, vector<64x512xbf16>, vector<16x512xf32> -> vector<16x512xf32>
    %4 = vector.extract_strided_slice %3 {offsets = [0, 0], sizes = [16, 256], strides = [1, 1]} : vector<16x512xf32> to vector<16x256xf32>
    %5 = vector.extract_strided_slice %3 {offsets = [0, 256], sizes = [16, 256], strides = [1, 1]} : vector<16x512xf32> to vector<16x256xf32>
    %6 = arith.negf %4 : vector<16x256xf32>
    %7 = math.exp %6 : vector<16x256xf32>
    %cst_3 = arith.constant 1.000000e+00 : f32
    %8 = vector.broadcast %cst_3 : f32 to vector<16x256xf32>
    %9 = arith.addf %8, %7 : vector<16x256xf32>
    %10 = arith.divf %8, %9 : vector<16x256xf32>
    %11 = arith.mulf %4, %10 : vector<16x256xf32>
    %12 = arith.mulf %11, %5 : vector<16x256xf32>
    %13 = arith.truncf %12 : vector<16x256xf32> to vector<16x256xbf16>
    %c0_4 = arith.constant 0 : index
    %c0_5 = arith.constant 0 : index
    %14 = vector.load %arg3[%c0_4, %c0_5] : memref<256x64xbf16, #tpu.memory_space<vmem>>, vector<256x64xbf16>
    %cst_6 = arith.constant dense<0.000000e+00> : vector<16x64xf32>
    %15 = tpu.matmul %13, %14, %cst_6 {dimension_numbers = #tpu.dot_dimension_numbers<[1], [0], [0], [1], [0, 0, 1, 1], [], []>} : vector<16x256xbf16>, vector<256x64xbf16>, vector<16x64xf32> -> vector<16x64xf32>
    %c0_7 = arith.constant 0 : index
    %c0_8 = arith.constant 0 : index
    %16 = vector.load %arg4[%c0_7, %c0_8] : memref<16x64xf32, #tpu.memory_space<vmem>>, vector<16x64xf32>
    tpu.vector_store %arg4[%c0_7, %c0_8], %15 {strides = array<i32>} : memref<16x64xf32, #tpu.memory_space<vmem>>, vector<16x64xf32>,
    return
  }
  func.func @transform_0(%arg0: i32) -> (i32, i32) {
    %c0_i32 = arith.constant 0 : i32
    %c0_i32_0 = arith.constant 0 : i32
    return %arg0, %c0_i32 : i32, i32
  }
  func.func @transform_1(%arg0: i32) -> (i32, i32) {
    %c0_i32 = arith.constant 0 : i32
    %c0_i32_0 = arith.constant 0 : i32
    %c0_i32_1 = arith.constant 0 : i32
    return %c0_i32, %c0_i32_0 : i32, i32
  }
  func.func @transform_2(%arg0: i32) -> (i32, i32) {
    %c0_i32 = arith.constant 0 : i32
    %c0_i32_0 = arith.constant 0 : i32
    %c0_i32_1 = arith.constant 0 : i32
    return %c0_i32, %c0_i32_0 : i32, i32
  }
  func.func @transform_3(%arg0: i32) -> (i32, i32) {
    %c0_i32 = arith.constant 0 : i32
    %c0_i32_0 = arith.constant 0 : i32
    return %arg0, %c0_i32 : i32, i32
  }
}

</mosaic_0001>

<bundles_post_ra>
// kernel: feed_forward.1
= control target key start
LH: loop header
LB: loop body
LE: loop exit
PB: predicated region body
PF: predicated region fallthrough
CT: control target
= control target key end

     0   :  { %s860_s0 = inlined_call_operand.vmem [shape: f32[16,64], index: 0, kind: input, shape index: {}]   ;;  %s861_s1 = inlined_call_operand.vmem [shape: bf16[64,512], index: 1, kind: input, shape index: {}]   ;;  %s862_s2 = inlined_call_operand.vmem [shape: bf16[256,64], index: 2, kind: input, shape index: {}]   ;;  %s863_s3 = inlined_call_operand.hbm [shape: f32[16,64], index: 3, kind: output, shape index: {}]  }
   0x1   :  { %v487_v0 = vld [vmem:[%s861_s1 + $0x60] sm:$0xf]  ;;  %v587_v1 = vld [vmem:[%s861_s1 + $0x6c] sm:$0xf0]  ;;  %v585_v2 = vld [vmem:[%s861_s1 + $0x64] sm:$0xf] }
   0x2   :  { %v488_v3 = vor.u32 %v587_v1, %v487_v0  ;;  %v489_v4 = vld [vmem:[%s861_s1 + $0x70] sm:$0xf0]  ;;  %v471_v5 = vld [vmem:[%s861_s1 + $0x40] sm:$0xf]  ;;  %v583_v6 = vld [vmem:[%s861_s1 + $0x4c] sm:$0xf0] }
   0x3   :  { %v492_v7 = vor.u32 %v585_v2, %v489_v4  ;;  %v581_v8 = vld [vmem:[%s861_s1 + $0x44] sm:$0xf]  ;;  %v473_v9 = vld [vmem:[%s861_s1 + $0x50] sm:$0xf0]  ;;  %v472_v10 = vor.u32 %v583_v6, %v471_v5  ;;  %v455_v12 = vld [vmem:[%s861_s1 + $0x20] sm:$0xf] }
   0x4   :  { %123 = vmatpush.bf16.msra.mxu2 %v488_v3  ;;  %v476_v11 = vor.u32 %v581_v8, %v473_v9  ;;  %v579_v13 = vld [vmem:[%s861_s1 + $0x2c] sm:$0xf0]  ;;  %v577_v14 = vld [vmem:[%s861_s1 + $0x24] sm:$0xf]  ;;  %v457_v15 = vld [vmem:[%s861_s1 + $0x30] sm:$0xf0] }
   0x5   :  { %137 = vmatpush.bf16.msra.mxu3 %v492_v7  ;;  %v456_v16 = vor.u32 %v579_v13, %v455_v12  ;;  %v460_v17 = vor.u32 %v577_v14, %v457_v15  ;;  %v439_v18 = vld [vmem:[%s861_s1] sm:$0xf]  ;;  %v575_v19 = vld [vmem:[%s861_s1 + $0xc] sm:$0xf0]  ;;  %v573_v20 = vld [vmem:[%s861_s1 + $0x4] sm:$0xf] }
   0x6   :  { %v441_v21 = vld [vmem:[%s861_s1 + $0x10] sm:$0xf0]  ;;  %v495_v22 = vld [vmem:[%s861_s1 + $0x68] sm:$0xf]  ;;  %v588_v23 = vld [vmem:[%s861_s1 + $0x74] sm:$0xf0]  ;;  %v440_v26 = vor.u32 %v575_v19, %v439_v18 }
   0x7   :  { %v586_v24 = vld [vmem:[%s861_s1 + $0x6c] sm:$0xf]  ;;  %v497_v25 = vld [vmem:[%s861_s1 + $0x78] sm:$0xf0]  ;;  %v16_v27 = vld [vmem:[%s860_s0] sm:$0xff] }
   0x8   :  { %124 = vmatpush.bf16.msra.mxu2 %v472_v10  ;;  %v17_v28 = vld [vmem:[%s860_s0 + $0x8] sm:$0xff] }
   0x9   :  { %138 = vmatpush.bf16.msra.mxu3 %v476_v11 }
   0xc   :  { %125 = vmatpush.bf16.msra.mxu2 %v456_v16 }
   0xd   :  { %8 = vsyncpa [#allocation3], 0  ;;  %139 = vmatpush.bf16.msra.mxu3 %v460_v17  ;;  %v444_v29 = vor.u32 %v573_v20, %v441_v21  ;;  %v496_v30 = vor.u32 %v588_v23, %v495_v22  ;;  %v500_v31 = vor.u32 %v586_v24, %v497_v25  ;;  %v479_v32 = vld [vmem:[%s861_s1 + $0x48] sm:$0xf]  ;;  %v584_v33 = vld [vmem:[%s861_s1 + $0x54] sm:$0xf0]  ;;  %v18_v34 = vpack.c.bf16 %v17_v28, %v16_v27 }
   0xe   :  { %v582_v35 = vld [vmem:[%s861_s1 + $0x4c] sm:$0xf]  ;;  %v481_v36 = vld [vmem:[%s861_s1 + $0x58] sm:$0xf0]  ;;  %vm115_vm0 = vcmask 523264   ;;  %v480_v37 = vor.u32 %v584_v33, %v479_v32  ;;  %v595_v53 = vld [vmem:[%s862_s2 + $0x30] sm:$0xff] }
   0xf   :  { %v484_v38 = vor.u32 %v582_v35, %v481_v36  ;;  %v463_v39 = vld [vmem:[%s861_s1 + $0x28] sm:$0xf]  ;;  %v580_v40 = vld [vmem:[%s861_s1 + $0x34] sm:$0xf0]  ;;  %v578_v41 = vld [vmem:[%s861_s1 + $0x2c] sm:$0xf] }
  0x10   :  { %126 = vmatpush.bf16.msra.mxu2 %v440_v26  ;;  %v465_v42 = vld [vmem:[%s861_s1 + $0x38] sm:$0xf0]  ;;  %v464_v43 = vor.u32 %v580_v40, %v463_v39  ;;  %v447_v45 = vld [vmem:[%s861_s1 + $0x8] sm:$0xf]  ;;  %v576_v46 = vld [vmem:[%s861_s1 + $0x14] sm:$0xf0] }
  0x11   :  { %140 = vmatpush.bf16.msra.mxu3 %v444_v29  ;;  %v468_v44 = vor.u32 %v578_v41, %v465_v42  ;;  %v574_v47 = vld [vmem:[%s861_s1 + $0xc] sm:$0xf]  ;;  %v449_v48 = vld [vmem:[%s861_s1 + $0x18] sm:$0xf0]  ;;  %v448_v49 = vor.u32 %v576_v46, %v447_v45  ;;  %v603_v54 = vld [vmem:[%s862_s2 + $0x70] sm:$0xff]  ;;  %s425_s30 = sshll.u32 %s863_s3, 4  ;;  %s426_s30 = int_to_ptr.hbm [resolvable:$true] %s425_s30 }
  0x12   :  { %v452_v50 = vor.u32 %v574_v47, %v449_v48  ;;  %v596_v51 = vld [vmem:[%s862_s2 + $0x38] sm:$0xff]  ;;  %v594_v55 = vld [vmem:[%s862_s2 + $0x28] sm:$0xff]  ;;  %v593_v57 = vld [vmem:[%s862_s2 + $0x20] sm:$0xff]  ;;  %s651_s4 = smov 128   ;;  %s652_s5 = smov 8  }
  0x13   :  { %501 = vmatmul.msk.bf16.vlgmr.msra.gmra.mxu2 %vm115_vm0, %v18_v34  ;;  %v604_v52 = vld [vmem:[%s862_s2 + $0x78] sm:$0xff]  ;;  %389 = vmatpush.bf16.msra.mxu0 %v596_v51  ;;  %v602_v56 = vld [vmem:[%s862_s2 + $0x68] sm:$0xff]  ;;  %v601_v58 = vld [vmem:[%s862_s2 + $0x60] sm:$0xff] }
  0x14   :  { %151 = vmatpush.bf16.msrb.mxu2 %v496_v30  ;;  %502 = vmatmul.msk.bf16.vlgmr.msra.gmra.mxu3 %vm115_vm0, %v18_v34  ;;  %v592_v59 = vld [vmem:[%s862_s2 + $0x18] sm:$0xff]  ;;  %v591_v1 = vld [vmem:[%s862_s2 + $0x10] sm:$0xff]  ;;  %v590_v3 = vld [vmem:[%s862_s2 + $0x8] sm:$0xff] }
  0x15   :  { %165 = vmatpush.bf16.msrb.mxu3 %v500_v31  ;;  %403 = vmatpush.bf16.msra.mxu1 %v604_v52  ;;  %v600_v60 = vld [vmem:[%s862_s2 + $0x58] sm:$0xff]  ;;  %v599_v2 = vld [vmem:[%s862_s2 + $0x50] sm:$0xff]  ;;  %v598_v4 = vld [vmem:[%s862_s2 + $0x48] sm:$0xff] }
  0x16   :  { %v589_v12 = vld [vmem:[%s862_s2] sm:$0xff] }
  0x17   :  { %390 = vmatpush.bf16.msra.mxu0 %v595_v53  ;;  %v597_v13 = vld [vmem:[%s862_s2 + $0x40] sm:$0xff]  ;;  %s650_s2 = smov [#allocation2]  }
  0x18   :  { %152 = vmatpush.bf16.msrb.mxu2 %v480_v37  ;;  %s423_s28 = sshll.u32 %s650_s2, 4  ;;  %s424_s28 = int_to_ptr.vmem [resolvable:$true] %s423_s28 }
  0x19   :  { %166 = vmatpush.bf16.msrb.mxu3 %v484_v38  ;;  %404 = vmatpush.bf16.msra.mxu1 %v603_v54 }
  0x1b   :  { %391 = vmatpush.bf16.msra.mxu0 %v594_v55 }
  0x1c   :  { %153 = vmatpush.bf16.msrb.mxu2 %v464_v43 }
  0x1d   :  { %167 = vmatpush.bf16.msrb.mxu3 %v468_v44  ;;  %405 = vmatpush.bf16.msra.mxu1 %v602_v56 }
  0x1f   :  { %392 = vmatpush.bf16.msra.mxu0 %v593_v57 }
  0x20   :  { %154 = vmatpush.bf16.msrb.mxu2 %v448_v49 }
  0x21   :  { %168 = vmatpush.bf16.msrb.mxu3 %v452_v50  ;;  %406 = vmatpush.bf16.msra.mxu1 %v601_v58 }
  0x23   :  { %503 = vmatmul.msk.bf16.vlgmr.msrb.gmra.mxu2 %vm115_vm0, %v18_v34  ;;  %393 = vmatpush.bf16.msra.mxu0 %v592_v59 }
  0x24   :  { %504 = vmatmul.msk.bf16.vlgmr.msrb.gmra.mxu3 %vm115_vm0, %v18_v34 }
  0x25   :  { %407 = vmatpush.bf16.msra.mxu1 %v600_v60 }
  0x27   :  { %394 = vmatpush.bf16.msra.mxu0 %v591_v1 }
  0x29   :  { %408 = vmatpush.bf16.msra.mxu1 %v599_v2 }
  0x2b   :  { %395 = vmatpush.bf16.msra.mxu0 %v590_v3 }
  0x2d   :  { %409 = vmatpush.bf16.msra.mxu1 %v598_v4 }
  0x2f   :  { %396 = vmatpush.bf16.msra.mxu0 %v589_v12 }
  0x31   :  { %410 = vmatpush.bf16.msra.mxu1 %v597_v13 }
  0x96   :  { %v809_v61 = vpop.f32.mrf.mxu2 }
  0x97   :  { %v505_v62 = vmul.f32 -1.442695, %v809_v61  ;;  %v812_v63 = vpop.f32.mrf.mxu3 }
  0x98   :  { %v506_v0 = vmul.f32 -1.442695, %v812_v63 }
  0x99   :  { %608 = vpow2.f32 %v505_v62 }
  0x9a   :  { %610 = vpow2.f32 %v506_v0 }
  0x9e   :  { %v827_v5 = vpop.f32.mrf.mxu2 }
  0x9f   :  { %v609_v6 = vpop.eup %608  ;;  %v507_v7 = vmul.f32 -1.442695, %v827_v5  ;;  %v830_v8 = vpop.f32.mrf.mxu3 }
  0xa0   :  { %v611_v9 = vpop.eup %610  ;;  %v187_v10 = vadd.f32 1.0, %v609_v6  ;;  %v508_v11 = vmul.f32 -1.442695, %v830_v8 }
  0xa1   :  { %v188_v14 = vadd.f32 1.0, %v611_v9  ;;  %612 = vpow2.f32 %v507_v7 }
  0xa2   :  { %614 = vrcp.f32 %v187_v10  ;;  %v202_v29 = vand.u32 2147483648, %v187_v10  ;;  %vm196_vm2 = vweird.f32 %v187_v10  ;;  %v200_v30 = vand.u32 2147483647, %v187_v10 }
  0xa3   :  { %616 = vrcp.f32 %v188_v14  ;;  %v215_v34 = vand.u32 2147483647, %v188_v14  ;;  %v217_v38 = vand.u32 2147483648, %v188_v14  ;;  %vm211_vm5 = vweird.f32 %v188_v14 }
  0xa4   :  { %618 = vpow2.f32 %v508_v11  ;;  %v203_v40 = vor.u32 1.1754944e-38, %v202_v29  ;;  %vm201_vm6 = vcmp.eq.f32.partialorder %v200_v30, 8.507059e+37 }
  0xa5   :  { %vm216_vm9 = vcmp.eq.f32.partialorder %v215_v34, 8.507059e+37  ;;  %v218_v50 = vor.u32 1.1754944e-38, %v217_v38 }
  0xa6   :  { %v156_v35 = vpop.f32.mrf.mxu2 }
  0xa7   :  { %v613_v15 = vpop.eup %612  ;;  %v170_v46 = vpop.f32.mrf.mxu3 }
  0xa8   :  { %v615_v16 = vpop.eup %614  ;;  %v189_v17 = vadd.f32 1.0, %v613_v15 }
  0xa9   :  { %v617_v18 = vpop.eup %616  ;;  %v192_v19 = vmul.f32 %v615_v16, %v187_v10  ;;  %vm197_vm1 = vweird.f32 %v615_v16 }
  0xaa   :  { %v619_v20 = vpop.eup %618  ;;  %v207_v21 = vmul.f32 %v617_v18, %v188_v14  ;;  %620 = vrcp.f32 %v189_v17  ;;  %vm839_vm3 = vmor %vm196_vm2, %vm197_vm1  ;;  %vm212_vm4 = vweird.f32 %v617_v18  ;;  %v232_v41 = vand.u32 2147483648, %v189_v17 }
  0xab   :  { %v193_v22 = vsub.f32 1.0, %v192_v19  ;;  %v190_v23 = vadd.f32 1.0, %v619_v20  ;;  %vm845_vm7 = vmor %vm211_vm5, %vm212_vm4  ;;  %v230_v45 = vand.u32 2147483647, %v189_v17  ;;  %vm226_vm10 = vweird.f32 %v189_v17 }
  0xac   :  { %v208_v24 = vsub.f32 1.0, %v207_v21  ;;  %v233_v53 = vor.u32 1.1754944e-38, %v232_v41 }
  0xad   :  { %v194_v25 = vmul.f32 %v615_v16, %v193_v22  ;;  %622 = vrcp.f32 %v190_v23  ;;  %v247_v52 = vand.u32 2147483648, %v190_v23  ;;  %v245_v55 = vand.u32 2147483647, %v190_v23 }
  0xae   :  { %v209_v26 = vmul.f32 %v617_v18, %v208_v24  ;;  %vm231_vm13 = vcmp.eq.f32.partialorder %v230_v45, 8.507059e+37  ;;  %vm241_vm14 = vweird.f32 %v190_v23  ;;  %v158_v3 = vpop.f32.mrf.mxu2 }
  0xaf   :  { %v195_v27 = vadd.f32 %v615_v16, %v194_v25  ;;  %v248_v0 = vor.u32 1.1754944e-38, %v247_v52  ;;  %vm246_vm1 = vcmp.eq.f32.partialorder %v245_v55, 8.507059e+37  ;;  %v172_v9 = vpop.f32.mrf.mxu3 }
  0xb0   :  { %v621_v28 = vpop.eup %620  ;;  %v210_v33 = vadd.f32 %v617_v18, %v209_v26 }
  0xb1   :  { %v222_v31 = vmul.f32 %v621_v28, %v189_v17  ;;  %v199_v37 = vsel %vm839_vm3, %v615_v16, %v195_v27  ;;  %vm227_vm8 = vweird.f32 %v621_v28 }
  0xb2   :  { %v204_v47 = vsel %vm201_vm6, %v203_v40, %v199_v37  ;;  %v214_v48 = vsel %vm845_vm7, %v617_v18, %v210_v33  ;;  %vm228_vm11 = vmor %vm226_vm10, %vm227_vm8 }
  0xb3   :  { %v623_v36 = vpop.eup %622  ;;  %v223_v39 = vsub.f32 1.0, %v222_v31  ;;  %v251_v56 = vmul.f32 %v204_v47, %v809_v61  ;;  %v219_v57 = vsel %vm216_vm9, %v218_v50, %v214_v48 }
  0xb4   :  { %v237_v42 = vmul.f32 %v623_v36, %v190_v23  ;;  %vm242_vm12 = vweird.f32 %v623_v36  ;;  %v252_v1 = vmul.f32 %v219_v57, %v812_v63 }
  0xb5   :  { %v224_v44 = vmul.f32 %v621_v28, %v223_v39  ;;  %vm243_vm15 = vmor %vm241_vm14, %vm242_vm12  ;;  %v255_v6 = vmul.f32 %v251_v56, %v156_v35 }
  0xb6   :  { %v238_v49 = vsub.f32 1.0, %v237_v42  ;;  %v256_v11 = vmul.f32 %v252_v1, %v170_v46 }
  0xb7   :  { %v225_v51 = vadd.f32 %v621_v28, %v224_v44 }
  0xb8   :  { %v239_v54 = vmul.f32 %v623_v36, %v238_v49 }
  0xb9   :  { %v229_v58 = vsel %vm228_vm11, %v621_v28, %v225_v51 }
  0xba   :  { %v234_v59 = vsel %vm231_vm13, %v233_v53, %v229_v58  ;;  %v240_v60 = vadd.f32 %v623_v36, %v239_v54 }
  0xbb   :  { %v253_v62 = vmul.f32 %v234_v59, %v827_v5 }
  0xbc   :  { %v244_v2 = vsel %vm243_vm15, %v623_v36, %v240_v60 }
  0xbd   :  { %v249_v4 = vsel %vm246_vm1, %v248_v0, %v244_v2  ;;  %v257_v7 = vmul.f32 %v253_v62, %v158_v3 }
  0xbe   :  { %v254_v61 = vmul.f32 %v249_v4, %v830_v8 }
  0xbf   :  { %v259_v10 = vpack.c.bf16 %v257_v7, %v255_v6 }
  0xc0   :  { %v258_v12 = vmul.f32 %v254_v61, %v172_v9 }
  0xc1   :  { %397 = vmatmul.bf16.vlgmr.msra.gmra.mxu0 %v259_v10 }
  0xc2   :  { %v260_v13 = vpack.c.bf16 %v258_v12, %v256_v11 }
  0xc4   :  { %411 = vmatmul.bf16.vlgmr.msra.gmra.mxu1 %v260_v13 }
 0x13e   :  { %v398_v5 = vpop.f32.mrf.mxu0 }
 0x141   :  { %v412_v14 = vpop.f32.mrf.mxu1 }
 0x142   :  { %v413_v15 = vadd.f32 %v412_v14, %v398_v5 }
 0x144   :  { %417 = vst.msk [vmem:[#allocation2] sm:$0xff] %vm115_vm0, %v413_v15 }
 0x146   :  { %v400_v63 = vpop.f32.mrf.mxu0 }
 0x149   :  { %v414_v8 = vpop.f32.mrf.mxu1 }
 0x14a   :  { %v415_v16 = vadd.f32 %v414_v8, %v400_v63 }
 0x14c   :  { %418 = vst.msk [vmem:[#allocation2 + $0x8] sm:$0xff] %vm115_vm0, %v415_v16 }
 0x14d   :  { %431 = dma.vmem_to_hbm [thread:$0]  %s424_s28, 256, %s426_s30, [#allocation3], %s651_s4, %s651_s4, %s652_s5  }
 0x14e   :  { %648 = dma.done.wait [#allocation3], 256  }
 0x14f   :  { %649 = vsyncadd [#allocation3], 4294967040 }
 0x150   :  { %436 = vsyncpa [#allocation3], 1 }

</bundles_post_ra>
